<compile_context>
chip_gen: v6e
topology: v6e:2x2x1
jax: 0.10.0
libtpu: 0.0.40
codegen_flags: <defaults>
</compile_context>

<pallas_src>
import math

import jax
import jax.numpy as jnp
from jax.experimental import pallas as pl
from jax.experimental.pallas import tpu as pltpu


# ---------------------------------------------------------------------------
# Parameter packing (done once, outside the kernels).
# ---------------------------------------------------------------------------
def pack_lstm_params(w_x2h, b_x2h, w_h2h, b_h2h, hidden_size):
    """Pack PyTorch-layout params into a single right-multiply weight.

    w_x2h: (4H, I), w_h2h: (4H, H), b_*: (4H,)  (gate order [f, i, g, o]).

    Returns:
      w_packed: (I+H, 4H)  -- [Wx ; Wh] transposed for xh @ W
      b_packed: (1, 4H)    -- combined bias
    The sigmoid-gate columns (f, i, o) are pre-scaled by 0.5 so the kernels
    can use the exact identity sigmoid(z) = 0.5*(tanh(z/2) + 1) with a single
    full-width tanh (the 0.5 scale commutes through the linear layer).
    """
    H = hidden_size
    w = jnp.concatenate([w_x2h.T, w_h2h.T], axis=0)          # (I+H, 4H)
    b = (b_x2h + b_h2h).reshape(1, 4 * H)                    # (1, 4H)
    col = jnp.arange(4 * H)
    g_cols = (col >= 2 * H) & (col < 3 * H)                  # tanh gate: no scale
    scale = jnp.where(g_cols, 1.0, 0.5).astype(jnp.float32)
    return (w * scale).astype(jnp.float32), (b * scale).astype(jnp.float32)


def _split_gates(t, H):
    """t = tanh(scaled gates) of shape (B, 4H); static slices along lanes."""
    ft = 0.5 * (t[:, 0 * H:1 * H] + 1.0)   # sigmoid(f)
    it = 0.5 * (t[:, 1 * H:2 * H] + 1.0)   # sigmoid(i)
    gt = t[:, 2 * H:3 * H]                  # tanh(g)
    ot = 0.5 * (t[:, 3 * H:4 * H] + 1.0)   # sigmoid(o)
    return ft, it, gt, ot


# ---------------------------------------------------------------------------
# Single-step LSTM cell kernel (fused matmul, separate hy/cy outputs).
# ---------------------------------------------------------------------------
def lstm_cell_kernel(xh_ref, c_ref, w_ref, b_ref, h_out_ref, c_out_ref):
    H = c_ref.shape[1]

    # One MXU matmul (K = I+H), f32 accumulation, bias broadcast.
    z = jnp.dot(xh_ref[...], w_ref[...], preferred_element_type=jnp.float32)
    z = z + b_ref[...]

    # Single full-width (B, 4H) tanh pass on the EUP.
    t = jnp.tanh(z)
    ft, it, gt, ot = _split_gates(t, H)

    cx = c_ref[...].astype(jnp.float32)
    cy = ft * cx + it * gt
    hy = ot * jnp.tanh(cy)

    h_out_ref[...] = hy.astype(h_out_ref.dtype)
    c_out_ref[...] = cy.astype(c_out_ref.dtype)


def lstm_cell(x, h, c, w_packed, b_packed, *, matmul_dtype=jnp.float32):
    """Single LSTM cell step. Matmul inputs may be cast to bf16; gate math
    and accumulation stay in f32."""
    B, H = h.shape
    xh = jnp.concatenate([x, h], axis=1).astype(matmul_dtype)   # (B, I+H)
    w = w_packed.astype(matmul_dtype)
    b = b_packed.astype(jnp.float32)

    full = lambda a: pl.BlockSpec(a.shape, lambda: (0,) * a.ndim)
    hy, cy = pl.pallas_call(
        lstm_cell_kernel,
        out_shape=(jax.ShapeDtypeStruct((B, H), x.dtype),
                   jax.ShapeDtypeStruct((B, H), x.dtype)),
        in_specs=[full(xh), full(c), full(w), full(b)],
        out_specs=(pl.BlockSpec((B, H), lambda: (0, 0)),
                   pl.BlockSpec((B, H), lambda: (0, 0))),
    )(xh, c, w, b)
    return hy, cy


# ---------------------------------------------------------------------------
# Sequence path, kernel (a): batched input projection for all time steps.
# ---------------------------------------------------------------------------
def input_proj_kernel(x_ref, wx_ref, b_ref, zx_ref):
    zx_ref[...] = (
        jnp.dot(x_ref[...], wx_ref[...], preferred_element_type=jnp.float32)
        + b_ref[...])


def _input_projection(x_flat, wx, b, *, row_tile=512):
    """zx = x_flat @ wx + b over all T*B rows, row-tiled, 'parallel' grid."""
    R, I = x_flat.shape
    G = wx.shape[1]
    rt = R if R <= row_tile else row_tile
    return pl.pallas_call(
        input_proj_kernel,
        out_shape=jax.ShapeDtypeStruct((R, G), jnp.float32),
        grid=(pl.cdiv(R, rt),),
        in_specs=[pl.BlockSpec((rt, I), lambda r: (r, 0)),
                  pl.BlockSpec(wx.shape, lambda r: (0, 0)),
                  pl.BlockSpec(b.shape, lambda r: (0, 0))],
        out_specs=pl.BlockSpec((rt, G), lambda r: (r, 0)),
        compiler_params=pltpu.CompilerParams(
            dimension_semantics=("parallel",)),
    )(x_flat, wx, b)


# ---------------------------------------------------------------------------
# Sequence path, kernel (b): serial recurrence with weights resident in VMEM.
# ---------------------------------------------------------------------------
def lstm_recurrence_kernel(zx_ref, h0_ref, c0_ref, wh_ref,
                           h_out_ref, c_out_ref, h_st, c_st):
    H = h0_ref.shape[1]
    t_idx = pl.program_id(0)

    @pl.when(t_idx == 0)
    def _():
        h_st[...] = h0_ref[...].astype(jnp.float32)
        c_st[...] = c0_ref[...].astype(jnp.float32)

    # Only the hidden projection is on the serial critical path; the input
    # projection zx_t was precomputed in one big parallel matmul.
    z = zx_ref[0] + jnp.dot(h_st[...].astype(wh_ref.dtype), wh_ref[...],
                            preferred_element_type=jnp.float32)

    tg = jnp.tanh(z)                        # one full-width EUP pass
    ft, it, gt, ot = _split_gates(tg, H)

    cy = ft * c_st[...] + it * gt
    hy = ot * jnp.tanh(cy)

    h_st[...] = hy
    c_st[...] = cy
    h_out_ref[0] = hy.astype(h_out_ref.dtype)
    c_out_ref[0] = cy.astype(c_out_ref.dtype)


def lstm_seq(x_seq, h0, c0, w_packed, b_packed, *, matmul_dtype=jnp.float32):
    """Run T LSTM steps: one parallel input-projection kernel + one serial
    recurrence kernel (weights resident, h/c carried in VMEM scratch)."""
    T, B, I = x_seq.shape
    H = h0.shape[1]
    G = 4 * H

    wx = w_packed[:I].astype(matmul_dtype)          # (I, 4H)
    wh = w_packed[I:].astype(matmul_dtype)          # (H, 4H)
    b = b_packed.astype(jnp.float32)

    # (a) All input projections in one row-tiled, megacore-parallel matmul.
    x_flat = x_seq.reshape(T * B, I).astype(matmul_dtype)
    zx = _input_projection(x_flat, wx, b).reshape(T, B, G)      # f32

    # (b) Serial recurrence over T.
    h_seq, c_seq = pl.pallas_call(
        lstm_recurrence_kernel,
        out_shape=(jax.ShapeDtypeStruct((T, B, H), x_seq.dtype),
                   jax.ShapeDtypeStruct((T, B, H), x_seq.dtype)),
        grid=(T,),
        in_specs=[
            pl.BlockSpec((1, B, G), lambda t: (t, 0, 0)),   # zx_t streamed
            pl.BlockSpec((B, H), lambda t: (0, 0)),         # h0 resident
            pl.BlockSpec((B, H), lambda t: (0, 0)),         # c0 resident
            pl.BlockSpec(wh.shape, lambda t: (0, 0)),       # Wh resident
        ],
        out_specs=(pl.BlockSpec((1, B, H), lambda t: (t, 0, 0)),
                   pl.BlockSpec((1, B, H), lambda t: (t, 0, 0))),
        scratch_shapes=[
            pltpu.VMEM((B, H), jnp.float32),        # h carry
            pltpu.VMEM((B, H), jnp.float32),        # c carry
        ],
        compiler_params=pltpu.CompilerParams(
            dimension_semantics=("arbitrary",),     # sequential recurrence
        ),
    )(zx, h0, c0, wh)
    return h_seq, c_seq


# ---------------------------------------------------------------------------
# Pure-JAX reference mirroring the PyTorch module exactly.
# ---------------------------------------------------------------------------
def lstm_cell_reference(x, h, c, w_x2h, b_x2h, w_h2h, b_h2h):
    gates = x @ w_x2h.T + b_x2h + h @ w_h2h.T + b_h2h
    ft, it, gt, ot = jnp.split(gates, 4, axis=1)   # torch.tensor_split order
    ft = jax.nn.sigmoid(ft)
    it = jax.nn.sigmoid(it)
    ot = jax.nn.sigmoid(ot)
    gt = jnp.tanh(gt)
    cy = ft * c + it * gt
    hy = ot * jnp.tanh(cy)
    return hy, cy


if __name__ == "__main__":
    B, INPUT_SIZE, HIDDEN_SIZE, T = 8, 16, 32, 8

    key = jax.random.PRNGKey(0)
    ks = jax.random.split(key, 8)

    # Param init matching reset_parameters(): U(-std, std), std = 1/sqrt(H).
    std = 1.0 / math.sqrt(HIDDEN_SIZE)
    w_x2h = jax.random.uniform(ks[0], (4 * HIDDEN_SIZE, INPUT_SIZE),
                               minval=-std, maxval=std, dtype=jnp.float32)
    w_h2h = jax.random.uniform(ks[1], (4 * HIDDEN_SIZE, HIDDEN_SIZE),
                               minval=-std, maxval=std, dtype=jnp.float32)
    b_x2h = jax.random.uniform(ks[2], (4 * HIDDEN_SIZE,),
                               minval=-std, maxval=std, dtype=jnp.float32)
    b_h2h = jax.random.uniform(ks[3], (4 * HIDDEN_SIZE,),
                               minval=-std, maxval=std, dtype=jnp.float32)

    x = jax.random.normal(ks[4], (B, INPUT_SIZE), dtype=jnp.float32)
    h0 = jax.random.normal(ks[5], (B, HIDDEN_SIZE), dtype=jnp.float32)
    c0 = jax.random.normal(ks[6], (B, HIDDEN_SIZE), dtype=jnp.float32)
    x_seq = jax.random.normal(ks[7], (T, B, INPUT_SIZE), dtype=jnp.float32)

    w_p, b_p = pack_lstm_params(w_x2h, b_x2h, w_h2h, b_h2h, HIDDEN_SIZE)

    # 1) Single cell, f32 matmul.
    hy, cy = lstm_cell(x, h0, c0, w_p, b_p)
    jax.block_until_ready((hy, cy))
    hy_r, cy_r = lstm_cell_reference(x, h0, c0, w_x2h, b_x2h, w_h2h, b_h2h)
    assert jnp.allclose(hy, hy_r, atol=2e-5, rtol=2e-5), "hy mismatch (f32)"
    assert jnp.allclose(cy, cy_r, atol=2e-5, rtol=2e-5), "cy mismatch (f32)"

    # 2) hx=None path (zeros), like the PyTorch default.
    zeros = jnp.zeros((B, HIDDEN_SIZE), dtype=jnp.float32)
    hy0, cy0 = lstm_cell(x, zeros, zeros, w_p, b_p)
    jax.block_until_ready((hy0, cy0))
    hy0_r, cy0_r = lstm_cell_reference(x, zeros, zeros, w_x2h, b_x2h, w_h2h, b_h2h)
    assert jnp.allclose(hy0, hy0_r, atol=2e-5, rtol=2e-5), "hy mismatch (zeros)"
    assert jnp.allclose(cy0, cy0_r, atol=2e-5, rtol=2e-5), "cy mismatch (zeros)"

    # 3) bf16 matmul-input path (f32 accumulation / gate math) — looser tol.
    hy_b, cy_b = lstm_cell(x, h0, c0, w_p, b_p, matmul_dtype=jnp.bfloat16)
    jax.block_until_ready((hy_b, cy_b))
    assert jnp.allclose(hy_b, hy_r, atol=5e-2, rtol=5e-2), "hy mismatch (bf16)"
    assert jnp.allclose(cy_b, cy_r, atol=5e-2, rtol=5e-2), "cy mismatch (bf16)"

    # 4) Sequence-fused kernels vs. step-by-step reference.
    h_seq, c_seq = lstm_seq(x_seq, h0, c0, w_p, b_p)
    jax.block_until_ready((h_seq, c_seq))
    h_r, c_r = h0, c0
    for t in range(T):
        h_r, c_r = lstm_cell_reference(x_seq[t], h_r, c_r,
                                       w_x2h, b_x2h, w_h2h, b_h2h)
        assert jnp.allclose(h_seq[t], h_r, atol=1e-4, rtol=1e-4), f"h_seq[{t}]"
        assert jnp.allclose(c_seq[t], c_r, atol=1e-4, rtol=1e-4), f"c_seq[{t}]"

    print("KERNEL_OK")
</pallas_src>

<mosaic_0001>
module attributes {stable_mosaic.version = 11 : i64} {
  func.func @lstm_cell_kernel(%arg0: memref<8x48xf32, #tpu.memory_space<vmem>>, %arg1: memref<8x32xf32, #tpu.memory_space<vmem>>, %arg2: memref<48x128xf32, #tpu.memory_space<vmem>>, %arg3: memref<1x128xf32, #tpu.memory_space<vmem>>, %arg4: memref<8x32xf32, #tpu.memory_space<vmem>>, %arg5: memref<8x32xf32, #tpu.memory_space<vmem>>) attributes {dimension_semantics = [], scalar_prefetch = 0 : i64, scratch_operands = 0 : i64, tpu.core_type = #tpu.core_type<tc>} {
    %c0 = arith.constant 0 : index
    %c0_0 = arith.constant 0 : index
    %0 = vector.load %arg0[%c0, %c0_0] : memref<8x48xf32, #tpu.memory_space<vmem>>, vector<8x48xf32>
    %c0_1 = arith.constant 0 : index
    %c0_2 = arith.constant 0 : index
    %1 = vector.load %arg2[%c0_1, %c0_2] : memref<48x128xf32, #tpu.memory_space<vmem>>, vector<48x128xf32>
    %cst = arith.constant dense<0.000000e+00> : vector<8x128xf32>
    %2 = tpu.matmul %0, %1, %cst {dimension_numbers = #tpu.dot_dimension_numbers<[1], [0], [0], [1], [0, 0, 1, 1], [], []>} : vector<8x48xf32>, vector<48x128xf32>, vector<8x128xf32> -> vector<8x128xf32>
    %c0_3 = arith.constant 0 : index
    %c0_4 = arith.constant 0 : index
    %3 = vector.load %arg3[%c0_3, %c0_4] : memref<1x128xf32, #tpu.memory_space<vmem>>, vector<1x128xf32>
    %4 = vector.broadcast %3 : vector<1x128xf32> to vector<8x128xf32>
    %5 = arith.addf %2, %4 : vector<8x128xf32>
    %6 = math.tanh %5 : vector<8x128xf32>
    %7 = vector.extract_strided_slice %6 {offsets = [0, 0], sizes = [8, 32], strides = [1, 1]} : vector<8x128xf32> to vector<8x32xf32>
    %cst_5 = arith.constant 1.000000e+00 : f32
    %8 = vector.broadcast %cst_5 : f32 to vector<8x32xf32>
    %9 = arith.addf %7, %8 : vector<8x32xf32>
    %cst_6 = arith.constant 5.000000e-01 : f32
    %10 = vector.broadcast %cst_6 : f32 to vector<8x32xf32>
    %11 = arith.mulf %10, %9 : vector<8x32xf32>
    %12 = vector.extract_strided_slice %6 {offsets = [0, 32], sizes = [8, 32], strides = [1, 1]} : vector<8x128xf32> to vector<8x32xf32>
    %cst_7 = arith.constant 1.000000e+00 : f32
    %13 = vector.broadcast %cst_7 : f32 to vector<8x32xf32>
    %14 = arith.addf %12, %13 : vector<8x32xf32>
    %cst_8 = arith.constant 5.000000e-01 : f32
    %15 = vector.broadcast %cst_8 : f32 to vector<8x32xf32>
    %16 = arith.mulf %15, %14 : vector<8x32xf32>
    %17 = vector.extract_strided_slice %6 {offsets = [0, 64], sizes = [8, 32], strides = [1, 1]} : vector<8x128xf32> to vector<8x32xf32>
    %18 = vector.extract_strided_slice %6 {offsets = [0, 96], sizes = [8, 32], strides = [1, 1]} : vector<8x128xf32> to vector<8x32xf32>
    %cst_9 = arith.constant 1.000000e+00 : f32
    %19 = vector.broadcast %cst_9 : f32 to vector<8x32xf32>
    %20 = arith.addf %18, %19 : vector<8x32xf32>
    %cst_10 = arith.constant 5.000000e-01 : f32
    %21 = vector.broadcast %cst_10 : f32 to vector<8x32xf32>
    %22 = arith.mulf %21, %20 : vector<8x32xf32>
    %c0_11 = arith.constant 0 : index
    %c0_12 = arith.constant 0 : index
    %23 = vector.load %arg1[%c0_11, %c0_12] : memref<8x32xf32, #tpu.memory_space<vmem>>, vector<8x32xf32>
    %24 = arith.mulf %11, %23 : vector<8x32xf32>
    %25 = arith.mulf %16, %17 : vector<8x32xf32>
    %26 = arith.addf %24, %25 : vector<8x32xf32>
    %27 = math.tanh %26 : vector<8x32xf32>
    %28 = arith.mulf %22, %27 : vector<8x32xf32>
    %c0_13 = arith.constant 0 : index
    %c0_14 = arith.constant 0 : index
    %29 = vector.load %arg4[%c0_13, %c0_14] : memref<8x32xf32, #tpu.memory_space<vmem>>, vector<8x32xf32>
    tpu.vector_store %arg4[%c0_13, %c0_14], %28 {strides = array<i32>} : memref<8x32xf32, #tpu.memory_space<vmem>>, vector<8x32xf32>,
    %c0_15 = arith.constant 0 : index
    %c0_16 = arith.constant 0 : index
    %30 = vector.load %arg5[%c0_15, %c0_16] : memref<8x32xf32, #tpu.memory_space<vmem>>, vector<8x32xf32>
    tpu.vector_store %arg5[%c0_15, %c0_16], %26 {strides = array<i32>} : memref<8x32xf32, #tpu.memory_space<vmem>>, vector<8x32xf32>,
    return
  }
}

</mosaic_0001>

<bundles_post_ra>
// kernel: tpu_custom_call.1
= control target key start
LH: loop header
LB: loop body
LE: loop exit
PB: predicated region body
PF: predicated region fallthrough
CT: control target
= control target key end

     0   :  { %11 = vsyncpa [#allocation3], 0  ;;  %s412_s0 = inlined_call_operand.hbm [shape: f32[8,48], index: 0, kind: input, shape index: {}]   ;;  %s413_s1 = inlined_call_operand.hbm [shape: f32[8,32], index: 1, kind: input, shape index: {}]   ;;  %s414_s2 = inlined_call_operand.hbm [shape: f32[48,128], index: 2, kind: input, shape index: {}]   ;;  %s415_s3 = inlined_call_operand.vmem [shape: f32[1,128], index: 3, kind: input, shape index: {}]   ;;  %s416_s4 = inlined_call_operand.hbm [shape: f32[8,32], index: 4, kind: output, shape index: {0}]   ;;  %s417_s5 = inlined_call_operand.hbm [shape: f32[8,32], index: 5, kind: output, shape index: {1}]  }
   0x1   :  { %12 = vsyncpa [#allocation6], 0 }
   0x2   :  { %13 = vsyncpa [#allocation4], 0 }
   0x3   :  { %14 = vsyncpa [#allocation10], 0  ;;  %s351_s18 = smov [#allocation5]   ;;  %s352_s20 = smov [#allocation2]  }
   0x4   :  { %s31_s19 = sshll.u32 %s351_s18, 4  ;;  %s21_s21 = sshll.u32 %s352_s20, 4  ;;  %s32_s19 = int_to_ptr.vmem [resolvable:$true] %s31_s19  ;;  %s22_s21 = int_to_ptr.vmem [resolvable:$true] %s21_s21 }
   0x5   :  { %s251_s22 = scalar_lea.vmem %s32_s19, 128  ;;  %p256_p1 = scmp.lt.s32.totalorder %s32_s19, %s32_s19 }
   0x6   :  { %p252_p0 = scmp.ne.s32.totalorder %s32_s19, %s251_s22  ;;  %p257_p2 = scmp.lt.s32.totalorder %s251_s22, %s251_s22 }
   0x8   :  { %p258_p3 = por %p257_p2, %p256_p1 }
   0xa   :  { %p259_p4 = pnand %p258_p3, %p252_p0 }
   0xc   :  { %262 = shalt.err (!%p259_p4)
}
   0xd   :  { %34 = dma.hbm_to_vmem [thread:$0]  %s413_s1, 128, %s32_s19, [#allocation6]  }
   0xe   :  { %s271_s25 = scalar_lea.vmem %s22_s21, 128  ;;  %p276_p6 = scmp.lt.s32.totalorder %s22_s21, %s22_s21 }
   0xf   :  { %p272_p5 = scmp.ne.s32.totalorder %s22_s21, %s271_s25  ;;  %p277_p7 = scmp.lt.s32.totalorder %s271_s25, %s271_s25 }
  0x11   :  { %p278_p8 = por %p277_p7, %p276_p6 }
  0x13   :  { %p279_p9 = pnand %p278_p8, %p272_p5 }
  0x15   :  { %282 = shalt.err (!%p279_p9)
}
  0x16   :  { %24 = dma.hbm_to_vmem [thread:$0]  %s412_s0, 128, %s22_s21, [#allocation3]  }
  0x17   :  { %s353_s28 = smov [#allocation7]  }
  0x18   :  { %s40_s29 = sshll.u32 %s353_s28, 4  ;;  %s41_s29 = int_to_ptr.vmem [resolvable:$true] %s40_s29 }
  0x19   :  { %s291_s30 = scalar_lea.vmem %s41_s29, 768  ;;  %p296_p11 = scmp.lt.s32.totalorder %s41_s29, %s41_s29 }
  0x1a   :  { %p292_p10 = scmp.ne.s32.totalorder %s41_s29, %s291_s30  ;;  %p297_p12 = scmp.lt.s32.totalorder %s291_s30, %s291_s30 }
  0x1c   :  { %p298_p13 = por %p297_p12, %p296_p11 }
  0x1e   :  { %p299_p0 = pnand %p298_p13, %p292_p10 }
  0x20   :  { %302 = shalt.err (!%p299_p0)
}
  0x21   :  { %s354_s1 = smov 128   ;;  %s355_s6 = smov 8  }
  0x22   :  { %46 = dma.hbm_to_vmem [thread:$0]  %s414_s2, 768, %s41_s29, [#allocation6], %s354_s1, %s354_s1, %s355_s6  }
  0x23   :  { %343 = dma.done.wait [#allocation3], 128  }
  0x24   :  { %344 = vsyncadd [#allocation3], 4294967168 }
  0x25   :  { %345 = dma.done.wait [#allocation6], 896  }
  0x26   :  { %346 = vsyncadd [#allocation6], 4294966400  ;;  %v356_v0 = vmov 0.0   ;;  %vm357_vm0 = vmmov 0   ;;  %v64_v1 = vld [vmem:[#allocation7 + $0x28] sm:$0xff]  ;;  %v63_v2 = vld [vmem:[#allocation7 + $0x20] sm:$0xff] }
  0x27   :  { %213 = vmatprep.subr.mxu0 %v356_v0  ;;  %225 = vmatprep.mubr.msk.f32.mxu0 %vm357_vm0, %v356_v0  ;;  %v62_v3 = vld [vmem:[#allocation7 + $0x18] sm:$0xff]  ;;  %v61_v4 = vld [vmem:[#allocation7 + $0x10] sm:$0xff]  ;;  %v60_v5 = vld [vmem:[#allocation7 + $0x8] sm:$0xff]  ;;  %vm72_vm1 = vcmask 392192   ;;  %s358_s9 = smov 96   ;;  %vm171_vm2 = vcmask 261120  }
  0x28   :  { %214 = vmatpush3.msra.mxu0 %v64_v1  ;;  %v59_v6 = vld [vmem:[#allocation7] sm:$0xff]  ;;  %v58_v7 = vld [vmem:[#allocation2] sm:$0xff]  ;;  %v149_v17 = vld [vmem:[#allocation5] sm:$0xff] }
  0x29   :  { %215 = vmatprep.subr.mxu0 %v356_v0  ;;  %v204_v8 = vld [vmem:[%s415_s3] ss:$0 sm:$0xff]  ;;  %s359_s3 = smov [#allocation9]  }
  0x2a   :  { %216 = vmatpush3.msra.mxu0 %v63_v2  ;;  %s190_s10 = sshll.u32 %s359_s3, 4  ;;  %s191_s10 = int_to_ptr.vmem [resolvable:$true] %s190_s10 }
  0x2b   :  { %217 = vmatprep.subr.mxu0 %v356_v0  ;;  %s303_s11 = scalar_lea.vmem %s191_s10, 128  ;;  %p308_p2 = scmp.lt.s32.totalorder %s191_s10, %s191_s10 }
  0x2c   :  { %218 = vmatpush3.msra.mxu0 %v62_v3  ;;  %p304_p1 = scmp.ne.s32.totalorder %s191_s10, %s303_s11  ;;  %p309_p3 = scmp.lt.s32.totalorder %s303_s11, %s303_s11 }
  0x2d   :  { %219 = vmatprep.subr.mxu0 %v356_v0 }
  0x2e   :  { %220 = vmatpush3.msra.mxu0 %v61_v4  ;;  %p310_p4 = por %p309_p3, %p308_p2 }
  0x2f   :  { %221 = vmatprep.subr.mxu0 %v356_v0 }
  0x30   :  { %222 = vmatpush3.msra.mxu0 %v60_v5  ;;  %p311_p5 = pnand %p310_p4, %p304_p1 }
  0x31   :  { %223 = vmatprep.subr.mxu0 %v356_v0 }
  0x32   :  { %224 = vmatpush3.msra.mxu0 %v59_v6 }
  0x33   :  { %226 = vmatmul.mubr.msk.f32.vlgmr.msra.gmra.mxu0 %vm72_vm1, %v58_v7 }
  0xf3   :  { %v142_v9 = vpop.f32.mrf.mxu0 }
  0xf4   :  { %v143_v10 = vadd.f32 %v204_v8, %v142_v9 }
  0xf5   :  { %v227_v11 = vpop.f32.mrf.mxu0 }
  0xf6   :  { %239 = vtanh.f32 %v143_v10 }
 0x103   :  { %v240_v12 = vpop.eup %239 }
 0x104   :  { %152 = vrot.lane.b32.xlu0 %v240_v12, %s358_s9  ;;  %v147_v13 = vadd.f32 1.0, %v240_v12 }
 0x106   :  { %v148_v14 = vmul.f32 0.5, %v147_v13 }
 0x108   :  { %v150_v18 = vmul.f32 %v149_v17, %v148_v14 }
 0x176   :  { %v153_v15 = vpop.permute.xlu0 %152 }
 0x177   :  { %v155_v16 = vmul.f32 %v153_v15, %v148_v14 }
 0x179   :  { %157 = vrot.lane.b32.xlu0 %v155_v16, %s358_s9 }
 0x1eb   :  { %v158_v19 = vpop.permute.xlu0 %157 }
 0x1ec   :  { %v160_v20 = vadd.f32 %v158_v19, %v150_v18 }
 0x1ee   :  { %241 = vtanh.f32 %v160_v20  ;;  %173 = vst.msk [vmem:[#allocation9] sm:$0xff] %vm171_vm2, %v160_v20 }
 0x1fb   :  { %v242_v21 = vpop.eup %241 }
 0x1fc   :  { %163 = vrot.lane.b32.xlu1 %v242_v21, %s358_s9 }
 0x1fd   :  { %314 = shalt.err (!%p311_p5)
}
 0x1fe   :  { %193 = dma.vmem_to_hbm [thread:$0]  %s191_s10, 128, %s417_s5, [#allocation10]  }
 0x1ff   :  { %s360_s14 = smov 32   ;;  %s361_s15 = smov [#allocation8]  }
 0x200   :  { %s180_s16 = sshll.u32 %s361_s15, 4  ;;  %s181_s16 = int_to_ptr.vmem [resolvable:$true] %s180_s16 }
 0x201   :  { %s323_s17 = scalar_lea.vmem %s181_s16, 128  ;;  %p328_p7 = scmp.lt.s32.totalorder %s181_s16, %s181_s16 }
 0x202   :  { %p324_p6 = scmp.ne.s32.totalorder %s181_s16, %s323_s17  ;;  %p329_p8 = scmp.lt.s32.totalorder %s323_s17, %s323_s17 }
 0x204   :  { %p330_p9 = por %p329_p8, %p328_p7 }
 0x206   :  { %p331_p10 = pnand %p330_p9, %p324_p6 }
 0x26e   :  { %v164_v22 = vpop.permute.xlu1 %163 }
 0x26f   :  { %v166_v23 = vmul.f32 %v164_v22, %v148_v14 }
 0x271   :  { %168 = vrot.lane.b32.xlu1 %v166_v23, %s360_s14 }
 0x2e3   :  { %v169_v24 = vpop.permute.xlu1 %168 }
 0x2e4   :  { %172 = vst.msk [vmem:[#allocation8] sm:$0xff] %vm171_vm2, %v169_v24 }
 0x2e5   :  { %334 = shalt.err (!%p331_p10)
}
 0x2e6   :  { %183 = dma.vmem_to_hbm [thread:$0]  %s181_s16, 128, %s416_s4, [#allocation4]  }
 0x2e7   :  { %347 = dma.done.wait [#allocation4], 128  }
 0x2e8   :  { %348 = vsyncadd [#allocation4], 4294967168 }
 0x2e9   :  { %349 = dma.done.wait [#allocation10], 128  }
 0x2ea   :  { %350 = vsyncadd [#allocation10], 4294967168 }
 0x2eb   :  { %200 = vsyncpa [#allocation3], 1 }
 0x2ec   :  { %201 = vsyncpa [#allocation6], 1 }
 0x2ed   :  { %202 = vsyncpa [#allocation4], 1 }
 0x2ee   :  { %203 = vsyncpa [#allocation10], 1 }

</bundles_post_ra>
